<compile_context>
chip_gen: v7x
topology: tpu7x:2x2x1
jax: 0.10.0
libtpu: 0.0.40
codegen_flags: <defaults>
</compile_context>

<pallas_src>
import functools

import numpy as np
import jax
import jax.numpy as jnp
from jax.experimental import pallas as pl
from jax.experimental.pallas import tpu as pltpu


def _bilinear_matrix(out_size: int, in_size: int) -> np.ndarray:
    """(out_size, in_size) interpolation matrix matching PyTorch bilinear,
    align_corners=False (half-pixel centers, negative sources clamped to 0)."""
    i = np.arange(out_size, dtype=np.float64)
    src = (i + 0.5) * (in_size / out_size) - 0.5
    src = np.clip(src, 0.0, None)
    i0 = np.minimum(np.floor(src).astype(np.int64), in_size - 1)
    i1 = np.minimum(i0 + 1, in_size - 1)
    l1 = src - i0
    l0 = 1.0 - l1
    w = np.zeros((out_size, in_size), dtype=np.float32)
    rows = np.arange(out_size)
    w[rows, i0] += l0.astype(np.float32)
    w[rows, i1] += l1.astype(np.float32)
    return w


def _depth_mse_kernel(pred_ref, gt_ref, wy_ref, wxt_ref, psum_ref, *,
                      n_total: int, has_tail: bool):
    # pred_ref: (nb, H, W)      channel-0 model output (channel squeezed by BlockSpec)
    # gt_ref:   (nb, Hin, Win)  channel-0 ground truth
    # wy_ref:   (H, Hin)        height interpolation matrix
    # wxt_ref:  (Win, W)        width interpolation matrix (transposed)
    # psum_ref: (1, 1, 1)       this step's partial sum of squared errors
    nb, hin, win = gt_ref.shape
    _, h, w = pred_ref.shape
    mat_dtype = wy_ref.dtype           # bf16 fast path or f32 (PyTorch-exact)

    wy = wy_ref[...]
    wxt = wxt_ref[...]

    # Width interpolation: ONE flat MXU matmul across the whole batch tile
    # (M = nb*Hin), f32 accumulation.
    g = gt_ref[...].astype(mat_dtype)                      # no-op when dtypes match
    t = jnp.dot(g.reshape(nb * hin, win), wxt,
                preferred_element_type=jnp.float32)        # (nb*Hin, W) f32
    t = t.astype(mat_dtype)                                # keep bf16 MXU path if bf16

    step = pl.program_id(0)
    acc = jnp.float32(0.0)
    # Height interpolation + squared error, one image at a time (static unroll,
    # nb is small): plain 2-D matmuls, no broadcast materialization, no big
    # transposes, and only (H, W)-sized f32 temporaries live at once.
    for i in range(nb):
        t_i = t[i * hin:(i + 1) * hin, :]                              # (Hin, W)
        r_i = jnp.dot(wy, t_i, preferred_element_type=jnp.float32)     # (H, W) f32
        d_i = pred_ref[i].astype(jnp.float32) - r_i
        sq_i = jnp.sum(d_i * d_i)
        if has_tail:
            # Padded images of the last (partial) batch block contribute 0.
            sq_i = jnp.where(step * nb + i < n_total, sq_i, 0.0)
        acc = acc + sq_i

    psum_ref[...] = acc.reshape(1, 1, 1)


@jax.jit
def depth_mse_loss(output: jax.Array, gt: jax.Array) -> jax.Array:
    """output: (N, C, H, W); gt: (N, Cg, Hin, Win). Returns scalar f32 loss."""
    n, _, h, w = output.shape
    _, _, hin, win = gt.shape

    # Matmul operand dtype: bf16 inputs stay bf16 (fast MXU path, f32 accum);
    # everything else computes in f32, matching PyTorch's gt.float() path.
    mat_dtype = jnp.bfloat16 if gt.dtype == jnp.bfloat16 else jnp.float32

    # ---- images per grid step (nb) -------------------------------------
    #  * keep the per-step working set (double-buffered input blocks + f32
    #    temporaries) under ~24 MiB -> fits the default scoped-VMEM limit on
    #    v5e/v6e/v7x without shrinking real-resolution tiles to nothing;
    #  * cap at ceil(N/2) so there are >= 2 grid steps whenever N >= 2
    #    (the batch axis is the "parallel" axis -> both v7x TCs get work).
    vmem_budget = 24 * 1024 * 1024
    isz_p = np.dtype(output.dtype).itemsize
    isz_g = np.dtype(gt.dtype).itemsize
    per_img = (2 * h * w * isz_p + 2 * hin * win * isz_g   # double-buffered blocks
               + hin * w * 4 + 2 * h * w * 4)              # t slice + r/d temporaries
    fixed = 2 * (h * hin + win * w) * np.dtype(mat_dtype).itemsize
    nb_vmem = max(1, (vmem_budget - fixed) // max(per_img, 1))
    nb = int(max(1, min(8, (n + 1) // 2, nb_vmem)))
    num_steps = int(pl.cdiv(n, nb))
    has_tail = (num_steps * nb != n)

    # Interpolation matrices are trace-time constants under jit.
    wy = jnp.asarray(_bilinear_matrix(h, hin), dtype=mat_dtype)                    # (H, Hin)
    wxt = jnp.asarray(np.ascontiguousarray(_bilinear_matrix(w, win).T), mat_dtype)  # (Win, W)

    kernel = functools.partial(_depth_mse_kernel, n_total=n, has_tail=has_tail)

    partials = pl.pallas_call(
        kernel,
        out_shape=jax.ShapeDtypeStruct((num_steps, 1, 1), jnp.float32),
        grid=(num_steps,),
        in_specs=[
            # Channel 0 selected in the BlockSpec (squeezed dim) — no
            # wrapper-side slice/cast copy of the inputs.
            pl.BlockSpec((nb, None, h, w), lambda i: (i, 0, 0, 0)),
            pl.BlockSpec((nb, None, hin, win), lambda i: (i, 0, 0, 0)),
            pl.BlockSpec((h, hin), lambda i: (0, 0)),
            pl.BlockSpec((win, w), lambda i: (0, 0)),
        ],
        out_specs=pl.BlockSpec((1, 1, 1), lambda i: (i, 0, 0)),
        compiler_params=pltpu.CompilerParams(
            dimension_semantics=("parallel",)),
    )(output, gt, wy, wxt)

    # Final reduction + mean denominator in the wrapper: exact regardless of
    # grid layout / tail padding (denominator is the true element count).
    return jnp.sum(partials) / jnp.float32(n * h * w)


if __name__ == "__main__":
    key = jax.random.PRNGKey(0)
    k1, k2 = jax.random.split(key)
    # model output: (N=2, C=4, H=16, W=16); ground-truth depth: (N=2, C=3, 8, 8)
    output = jax.random.normal(k1, (2, 4, 16, 16), dtype=jnp.float32)
    gt = jax.random.normal(k2, (2, 3, 8, 8), dtype=jnp.float32)

    loss = depth_mse_loss(output, gt)
    jax.block_until_ready(loss)
    print("KERNEL_OK")
</pallas_src>

<mosaic_0001>
module attributes {stable_mosaic.version = 11 : i64} {
  func.func @_depth_mse_kernel(%arg0: i32, %arg1: memref<1x1x16x16xf32, #tpu.memory_space<vmem>>, %arg2: memref<1x1x8x8xf32, #tpu.memory_space<vmem>>, %arg3: memref<16x8xf32, #tpu.memory_space<vmem>>, %arg4: memref<8x16xf32, #tpu.memory_space<vmem>>, %arg5: memref<1x1x1xf32, #tpu.memory_space<vmem>>) attributes {dimension_semantics = [#tpu.dimension_semantics<parallel>], iteration_bounds = array<i64: 2>, scalar_prefetch = 0 : i64, scratch_operands = 0 : i64, tpu.core_type = #tpu.core_type<tc>, window_params = [{transform_indices = @transform_0, window_bounds = array<i64: 1, 1, 16, 16>}, {transform_indices = @transform_1, window_bounds = array<i64: 1, 1, 8, 8>}, {pipeline_mode = #tpu.pipeline_mode<synchronous>, transform_indices = @transform_2, window_bounds = array<i64: 16, 8>}, {pipeline_mode = #tpu.pipeline_mode<synchronous>, transform_indices = @transform_3, window_bounds = array<i64: 8, 16>}, {transform_indices = @transform_4, window_bounds = array<i64: 1, 1, 1>}]} {
    %c0 = arith.constant 0 : index
    %c0_0 = arith.constant 0 : index
    %0 = vector.load %arg3[%c0, %c0_0] : memref<16x8xf32, #tpu.memory_space<vmem>>, vector<16x8xf32>
    %c0_1 = arith.constant 0 : index
    %c0_2 = arith.constant 0 : index
    %1 = vector.load %arg4[%c0_1, %c0_2] : memref<8x16xf32, #tpu.memory_space<vmem>>, vector<8x16xf32>
    %c0_3 = arith.constant 0 : index
    %c0_4 = arith.constant 0 : index
    %c0_5 = arith.constant 0 : index
    %c0_6 = arith.constant 0 : index
    %2 = vector.load %arg2[%c0_3, %c0_4, %c0_5, %c0_6] : memref<1x1x8x8xf32, #tpu.memory_space<vmem>>, vector<1x1x8x8xf32>
    %3 = vector.shape_cast %2 : vector<1x1x8x8xf32> to vector<1x8x8xf32>
    %4 = vector.shape_cast %3 : vector<1x8x8xf32> to vector<8x8xf32>
    %cst = arith.constant dense<0.000000e+00> : vector<8x16xf32>
    %5 = tpu.matmul %4, %1, %cst {dimension_numbers = #tpu.dot_dimension_numbers<[1], [0], [0], [1], [0, 0, 1, 1], [], []>} : vector<8x8xf32>, vector<8x16xf32>, vector<8x16xf32> -> vector<8x16xf32>
    %cst_7 = arith.constant dense<0.000000e+00> : vector<16x16xf32>
    %6 = tpu.matmul %0, %5, %cst_7 {dimension_numbers = #tpu.dot_dimension_numbers<[1], [0], [0], [1], [0, 0, 1, 1], [], []>} : vector<16x8xf32>, vector<8x16xf32>, vector<16x16xf32> -> vector<16x16xf32>
    %c0_8 = arith.constant 0 : index
    %c0_9 = arith.constant 0 : index
    %c0_10 = arith.constant 0 : index
    %c0_11 = arith.constant 0 : index
    %7 = vector.load %arg1[%c0_8, %c0_9, %c0_10, %c0_11] : memref<1x1x16x16xf32, #tpu.memory_space<vmem>>, vector<1x1x16x16xf32>
    %8 = vector.shape_cast %7 : vector<1x1x16x16xf32> to vector<16x16xf32>
    %9 = arith.subf %8, %6 : vector<16x16xf32>
    %10 = arith.mulf %9, %9 : vector<16x16xf32>
    %11 = vector.shape_cast %10 : vector<16x16xf32> to vector<1x16x16xf32>
    %cst_12 = arith.constant dense<0.000000e+00> : vector<1xf32>
    %12 = vector.multi_reduction <add>, %11, %cst_12 [1, 2] : vector<1x16x16xf32> to vector<1xf32>
    %13 = vector.shape_cast %12 : vector<1xf32> to vector<1x1x1xf32>
    %14 = vector.extract %13[0, 0, 0] : f32 from vector<1x1x1xf32>
    %cst_13 = arith.constant 0.000000e+00 : f32
    %15 = arith.addf %cst_13, %14 : f32
    %16 = vector.broadcast %15 : f32 to vector<1x1x1xf32>
    %c0_14 = arith.constant 0 : index
    %c0_15 = arith.constant 0 : index
    %c0_16 = arith.constant 0 : index
    %17 = vector.load %arg5[%c0_14, %c0_15, %c0_16] : memref<1x1x1xf32, #tpu.memory_space<vmem>>, vector<1x1x1xf32>
    tpu.vector_store %arg5[%c0_14, %c0_15, %c0_16], %16 {strides = array<i32>} : memref<1x1x1xf32, #tpu.memory_space<vmem>>, vector<1x1x1xf32>,
    return
  }
  func.func @transform_0(%arg0: i32) -> (i32, i32, i32, i32) {
    %c0_i32 = arith.constant 0 : i32
    %c0_i32_0 = arith.constant 0 : i32
    %c0_i32_1 = arith.constant 0 : i32
    %c0_i32_2 = arith.constant 0 : i32
    return %arg0, %c0_i32, %c0_i32_0, %c0_i32_1 : i32, i32, i32, i32
  }
  func.func @transform_1(%arg0: i32) -> (i32, i32, i32, i32) {
    %c0_i32 = arith.constant 0 : i32
    %c0_i32_0 = arith.constant 0 : i32
    %c0_i32_1 = arith.constant 0 : i32
    %c0_i32_2 = arith.constant 0 : i32
    return %arg0, %c0_i32, %c0_i32_0, %c0_i32_1 : i32, i32, i32, i32
  }
  func.func @transform_2(%arg0: i32) -> (i32, i32) {
    %c0_i32 = arith.constant 0 : i32
    %c0_i32_0 = arith.constant 0 : i32
    %c0_i32_1 = arith.constant 0 : i32
    return %c0_i32, %c0_i32_0 : i32, i32
  }
  func.func @transform_3(%arg0: i32) -> (i32, i32) {
    %c0_i32 = arith.constant 0 : i32
    %c0_i32_0 = arith.constant 0 : i32
    %c0_i32_1 = arith.constant 0 : i32
    return %c0_i32, %c0_i32_0 : i32, i32
  }
  func.func @transform_4(%arg0: i32) -> (i32, i32, i32) {
    %c0_i32 = arith.constant 0 : i32
    %c0_i32_0 = arith.constant 0 : i32
    %c0_i32_1 = arith.constant 0 : i32
    return %arg0, %c0_i32, %c0_i32_0 : i32, i32, i32
  }
}

</mosaic_0001>

<bundles_post_ra>
// kernel: depth_mse_loss.1
= control target key start
LH: loop header
LB: loop body
LE: loop exit
PB: predicated region body
PF: predicated region fallthrough
CT: control target
= control target key end

     0   :  { %9 = vsyncpa [#allocation3], 0  ;;  %s989_s0 = inlined_call_operand.hbm [shape: f32[2,4,16,16], index: 0, kind: input, shape index: {}]   ;;  %s990_s1 = inlined_call_operand.hbm [shape: f32[2,3,8,8], index: 1, kind: input, shape index: {}]   ;;  %s991_s2 = inlined_call_operand.hbm [shape: f32[16,8], index: 2, kind: input, shape index: {}]   ;;  %s992_s3 = inlined_call_operand.vmem [shape: f32[8,16], index: 3, kind: input, shape index: {}]   ;;  %s993_s4 = inlined_call_operand.vmem [shape: f32[2,1,1], index: 4, kind: output, shape index: {}]  }
   0x1   :  { %11 = vsyncpa [#allocation3 + $0x1], 0 }
   0x2   :  { %12 = vsyncpa [#allocation5], 0 }
   0x3   :  { %14 = vsyncpa [#allocation5 + $0x1], 0  ;;  %s799_s15 = smov 0   ;;  %s801_s16 = smov 0  }
   0x4   :  { %s803_s17 = smov 0   ;;  %s805_s18 = smov 0  }
   0x5 LB: > { %s818_s19 = sadd.s32 4294967295, %s765_s18   ;;  %p40_p0 = scmp.ne.s32.totalorder %s757_s16, %s753_s15  ;;  %s765_s18 = sphi %s805_s18, %s1008_s18   ;;  %s761_s17 = sphi %s803_s17, %s1007_s17   ;;  %s757_s16 = sphi %s801_s16, %s1006_s16   ;;  %s753_s15 = sphi %s799_s15, %s1005_s15  }
   0x6   : > { %p994_p1 = scmp.eq.s32.totalorder %s818_s19, 0  ;;  %p540_p2 = scmp.ge.s32.totalorder %s765_s18, 1 }
   0x7   : > { %p145_p3 = scmp.lt.s32.totalorder %s765_s18, 3  ;;  %s767_s22 = smov [#allocation6]  }
   0x8   : > { %p826_p4 = por %p994_p1, %p40_p0  ;;  %s157_s23 = sshll.u32 %s767_s22, 4  ;;  %s158_s23 = int_to_ptr.vmem [resolvable:$true] %s157_s23 }
   0x9   : > { %p830_p5 = pnand %p540_p2, %p145_p3  ;;  %s843_s25 = sadd.s32 1, %s765_s18  }
   0xa   : > { %s997_s20 = scalar_select %p826_p4, 1, 0 }
   0xb   : > { %s998_s21 = scalar_select %p830_p5, 1, 0 }
   0xc   : > { %p584_p6 = pneg %p830_p5  ;;  %s27_s26 = sadd.s32 1, %s761_s17 }
   0xd   : > { %s24_s27 = ssub.s32 %s765_s18, %s843_s25  ;;  %s635_s30 = scalar_lea.hbm %s991_s2, 256 }
   0xe   : > { %p838_p7 = pnand %p584_p6, %p994_p1  ;;  %p636_p8 = scmp.ne.s32.totalorder %s991_s2, %s635_s30 }
   0xf   : > { %p642_p12 = scmp.lt.u32.totalorder %s635_s30, %s991_s2 }
  0x10   : > { %p637_p9 = pneg %p838_p7 }
  0x12   : > { %p638_p10 = pnand %p637_p9, %p636_p8 }
  0x14   : > { %p639_p11 = pneg %p638_p10 }
  0x16   : > { %p644_p13 = pnand %p642_p12, %p639_p11 }
  0x18   : > { %647 = shalt.err (!%p644_p13)
}
  0x19   : > { %s648_s9 = scalar_lea.vmem %s158_s23, 256  ;;  %p656_p6 = scmp.lt.s32.totalorder %s158_s23, %s158_s23 }
  0x1a   : > { %p649_p0 = scmp.ne.s32.totalorder %s158_s23, %s648_s9  ;;  %p657_p1 = scmp.lt.s32.totalorder %s648_s9, %s648_s9 }
  0x1c   : > { %p651_p2 = pnand %p649_p0, %p637_p9  ;;  %p658_p4 = por %p657_p1, %p656_p6 }
  0x1e   : > { %p652_p3 = pneg %p651_p2 }
  0x20   : > { %p659_p5 = pnand %p658_p4, %p652_p3 }
  0x22   : > { %662 = shalt.err (!%p659_p5)
}
  0x23   : > { %s768_s10 = smov 128   ;;  %s769_s11 = smov 8  }
  0x24   : > { %587 = dma.hbm_to_vmem [thread:$0]  (!%p838_p7), %s991_s2, 256, %s158_s23, [#allocation5], %s768_s10, %s768_s10, %s769_s11  }
  0x25   : > { %p25_p1 = scmp.eq.s32.totalorder %s24_s27, 0  ;;  %p34_p4 = scmp.ne.s32.totalorder %s761_s17, %s757_s16 }
  0x26   : > { %p35_p5 = scmp.eq.s32.totalorder %s765_s18, 0  ;;  %p596_p8 = scmp.lt.s32.totalorder %s765_s18, 2 }
  0x27   : > { %s872_s14 = scalar_select %p25_p1, %s761_s17, %s27_s26  }
  0x28   : > { %p36_p9 = por %p35_p5, %p34_p4  ;;  %s875_s15 = sand.u32 1, %s761_s17  }
  0x29   : > { %s543_s22 = sshll.u32 %s875_s15, 4  ;;  %s557_s24 = sshll.u32 %s765_s18, 10 }
  0x2a   : > { %s882_s30 = scalar_lea.hbm %s989_s0, %s557_s24  ;;  %s178_s23 = scalar_lea.vmem [#allocation2], %s543_s22 }
  0x2b   : > { %s185_s26 = sshll.u32 %s178_s23, 4  ;;  %p886_p7 = pnand %p596_p8, %p36_p9  ;;  %s884_s26 = int_to_ptr.vmem [resolvable:$true] %s185_s26 }
  0x2c   : > { %s195_s5 = sand.u32 1, %s765_s18   ;;  %s546_s6 = sshll.u32 %s875_s15, 3 }
  0x2d   : > { %s175_s7 = scalar_lea.sflag [#allocation3], %s875_s15  ;;  %s663_s8 = scalar_lea.hbm %s882_s30, 256 }
  0x2e   : > { %p664_p10 = scmp.ne.s32.totalorder %s882_s30, %s663_s8  ;;  %p665_p11 = pneg %p886_p7 }
  0x2f   : > { %s668_s13 = scalar_lea.hbm %s989_s0, 2048  ;;  %p669_p0 = scmp.lt.u32.totalorder %s882_s30, %s989_s0 }
  0x30   : > { %p666_p12 = pnand %p665_p11, %p664_p10  ;;  %p670_p2 = scmp.lt.u32.totalorder %s668_s13, %s663_s8 }
  0x31   : > { %p672_p6 = scmp.lt.u32.totalorder %s663_s8, %s882_s30 }
  0x32   : > { %p667_p13 = pneg %p666_p12  ;;  %p671_p3 = por %p670_p2, %p669_p0 }
  0x34   : > { %p673_p1 = por %p672_p6, %p671_p3 }
  0x36   : > { %p674_p4 = pnand %p673_p1, %p667_p13 }
  0x38   : > { %677 = shalt.err (!%p674_p4)
}
  0x39   : > { %s678_s28 = scalar_lea.vmem %s884_s26, 256  ;;  %s770_s29 = smov [#allocation2]  }
  0x3a   : > { %p679_p5 = scmp.ne.s32.totalorder %s884_s26, %s678_s28  ;;  %s683_s23 = sshll.u32 %s770_s29, 4  ;;  %s684_s23 = int_to_ptr.vmem [resolvable:$false] %s683_s23 }
  0x3b   : > { %s685_s9 = scalar_lea.vmem %s684_s23, 512  ;;  %p686_p10 = scmp.lt.s32.totalorder %s884_s26, %s684_s23 }
  0x3c   : > { %p681_p8 = pnand %p679_p5, %p665_p11  ;;  %p687_p12 = scmp.lt.s32.totalorder %s685_s9, %s678_s28 }
  0x3e   : > { %p682_p9 = pneg %p681_p8  ;;  %p688_p0 = por %p687_p12, %p686_p10 }
  0x40   : > { %p689_p2 = pnand %p688_p0, %p682_p9 }
  0x42   : > { %692 = shalt.err (!%p689_p2)
}
  0x43   : > { %591 = dma.hbm_to_vmem [thread:$0]  (!%p886_p7), %s882_s30, 256, %s884_s26, %s175_s7, %s768_s10, %s768_s10, %s769_s11  }
  0x44   : > { %s573_s8 = smul.u32 384, %s765_s18  ;;  %s199_s12 = scalar_lea.vmem [#allocation4], %s546_s6 }
  0x45   : > { %s207_s13 = sshll.u32 %s199_s12, 4  ;;  %s196_s29 = scalar_lea.sflag [#allocation5], %s195_s5  ;;  %s208_s13 = int_to_ptr.vmem [resolvable:$true] %s207_s13 }
  0x46   : > { %s929_s28 = scalar_lea.hbm %s990_s1, %s573_s8  ;;  %s698_s15 = scalar_lea.hbm %s990_s1, 768 }
  0x47   : > { %s693_s23 = scalar_lea.hbm %s929_s28, 128  ;;  %p699_p1 = scmp.lt.u32.totalorder %s929_s28, %s990_s1 }
  0x48   : > { %p694_p13 = scmp.ne.s32.totalorder %s929_s28, %s693_s23  ;;  %p700_p4 = scmp.lt.u32.totalorder %s698_s15, %s693_s23 }
  0x49   : > { %p702_p8 = scmp.lt.u32.totalorder %s693_s23, %s929_s28 }
  0x4a   : > { %p696_p3 = pnand %p694_p13, %p665_p11  ;;  %p701_p5 = por %p700_p4, %p699_p1 }
  0x4c   : > { %p697_p6 = pneg %p696_p3  ;;  %p703_p9 = por %p702_p8, %p701_p5 }
  0x4e   : > { %p704_p10 = pnand %p703_p9, %p697_p6 }
  0x50   : > { %707 = shalt.err (!%p704_p10)
}
  0x51   : > { %s708_s18 = scalar_lea.vmem %s208_s13, 128  ;;  %s771_s5 = smov [#allocation4]  }
  0x52   : > { %p709_p12 = scmp.ne.s32.totalorder %s208_s13, %s708_s18  ;;  %s713_s6 = sshll.u32 %s771_s5, 4  ;;  %s714_s6 = int_to_ptr.vmem [resolvable:$false] %s713_s6 }
  0x53   : > { %s715_s7 = scalar_lea.vmem %s714_s6, 256  ;;  %p716_p13 = scmp.lt.s32.totalorder %s208_s13, %s714_s6 }
  0x54   : > { %p711_p0 = pnand %p709_p12, %p665_p11  ;;  %p717_p3 = scmp.lt.s32.totalorder %s715_s7, %s708_s18 }
  0x56   : > { %p712_p2 = pneg %p711_p0  ;;  %p718_p1 = por %p717_p3, %p716_p13 }
  0x58   : > { %p719_p4 = pnand %p718_p1, %p712_p2 }
  0x5a   : > { %722 = shalt.err (!%p719_p4)
}
  0x5b   : > { %594 = dma.hbm_to_vmem [thread:$0]  (!%p886_p7), %s929_s28, 128, %s208_s13, %s196_s29  }
  0x5c   : > { %p1001_p6 = scmp.ne.s32.totalorder %s998_s21, 0 }
  0x5d   : > { %s218_s9 = sand.u32 (!%p1001_p6), 1, %s757_s16   ;;  %p1002_p11 = scmp.ne.s32.totalorder (!%p1001_p6), %s997_s20, 0 }
  0x5e   : > { %216 = sbr.rel (%p1001_p6) target bundleno = 751 (0x2ef), region = 36  ;;  %s549_s8 = sshll.u32 (!%p1001_p6), %s218_s9, 4 }
  0x5f   : > { %s219_s12 = scalar_lea.sflag (!%p1001_p6), [#allocation3], %s218_s9  ;;  %s222_s22 = scalar_lea.vmem (!%p1001_p6), [#allocation2], %s549_s8 }
  0x65   : > { %740 = dma.done.wait (%p1002_p11), %s219_s12, 256  }
  0x66   : > { %742 = vsyncadd (%p1002_p11), %s219_s12, 4294967040  ;;  %s227_s24 = sand.u32 1, %s818_s19   ;;  %s550_s27 = sshll.u32 %s218_s9, 3 }
  0x67   : > { %s228_s23 = scalar_lea.sflag [#allocation5], %s227_s24  ;;  %s231_s13 = scalar_lea.vmem [#allocation4], %s550_s27 }
  0x68   : > { %744 = dma.done.wait (%p1002_p11), %s228_s23, 128  }
  0x69   : > { %746 = vsyncadd (%p1002_p11), %s228_s23, 4294967168  ;;  %p1003_p7 = scmp.eq.s32.totalorder %s818_s19, 0 }
  0x6b   : > { %748 = dma.done.wait (%p1003_p7), [#allocation5], 256   ;;  %p1004_p5 = pmov %p1003_p7 }
  0x6c   : > { %v772_v0 = vmov 0.0   ;;  %vm773_vm0 = vmmov 0   ;;  %vm270_vm1 = vcmask 64512   ;;  %v268_v1 = vld [vmem:[%s992_s3] sm:$0xff]  ;;  %v266_v3 = vld [vmem:[#allocation6] sm:$0xff]  ;;  %v267_v5 = vld [vmem:[#allocation6 + $0x8] sm:$0xff] }
  0x6d   : > { %750 = vsyncadd (%p1004_p5), [#allocation5], 4294967040  ;;  %563 = vmatprep.subr.mxu0 %v772_v0  ;;  %565 = vmatprep.mubr.msk.f32.mxu0 %vm773_vm0, %v772_v0  ;;  %v269_v2 = vld [vmem:[%s231_s13] sm:$0xff]  ;;  %v426_v7 = vld [vmem:[%s222_s22 + $0x8] sm:$0xff]  ;;  %vm431_vm2 = vcmask 130048   ;;  %p263_p8 = scmp.lt.s32.totalorder %s818_s19, 1 }
  0x6e   : > { %564 = vmatpush3.msra.mxu0 %v268_v1  ;;  %570 = vmatprep.mubr.msk.f32.mxu1 %vm270_vm1, %v266_v3  ;;  %v425_v8 = vld [vmem:[%s222_s22] sm:$0xff]  ;;  %vm446_vm3 = vcmask 0  }
  0x6f   : > { %566 = vmatmul.mubr.msk.f32.vlgmr.msra.gmra.mrb[0].mxu0 %vm270_vm1, %v269_v2  ;;  %s1010_s19 = smov (!%p263_p8, %s818_s19), 1 }
  0x70   : > { %s265_s10 = scalar_lea.vmem %s993_s4, %s1010_s19 }
 0x142   : > { %v340_v4 = vpop.f32.mrb[0].mxu0 }
 0x143   : > { %v567_v6 = vpop.f32.mrb[1].mxu0  ;;  %568 = vmatprep.subr.mxu1 %v340_v4 }
 0x144   : > { %569 = vmatpush3.msra.mxu1 %v340_v4 }
 0x145   : > { %571 = vmatmul.mubr.msk.f32.vlgmr.msra.gmra.mrb[0].mxu1 %vm270_vm1, %v267_v5 }
 0x218   : > { %v572_v9 = vpop.f32.mrb[0].mxu1 }
 0x219   : > { %v428_v10 = vsub.f32 %v426_v7, %v572_v9  ;;  %v416_v11 = vpop.f32.mrb[1].mxu1 }
 0x21a   : > { %v427_v12 = vsub.f32 %v425_v8, %v416_v11 }
 0x21b   : > { %v430_v13 = vmul.f32 %v428_v10, %v428_v10 }
 0x21c   : > { %v429_v14 = vmul.f32 %v427_v12, %v427_v12 }
 0x21d   : > { %v433_v15 = vsel %vm431_vm2, %v430_v13, 0.0 }
 0x21e   : > { %v432_v16 = vsel %vm431_vm2, %v429_v14, 0.0 }
 0x21f   : > { %v434_v17 = vadd.f32 %v433_v15, %v432_v16 }
 0x221   : > { %435 = vadd.xlane.f32.xlu0 %v434_v17 }
 0x2ae   : > { %v436_v18 = vpop.xlane.xlu0 %435 }
 0x2af   : > { %v437_v19 = vrot.slane %v436_v18, 4 }
 0x2b1   : > { %v438_v20 = vadd.f32 %v437_v19, %v436_v18 }
 0x2b3   : > { %v439_v21 = vrot.slane %v438_v20, 2 }
 0x2b5   : > { %v440_v22 = vadd.f32 %v439_v21, %v438_v20 }
 0x2b7   : > { %v441_v23 = vrot.slane %v440_v22, 1 }
 0x2b9   : > { %v442_v24 = vadd.f32 %v441_v23, %v440_v22 }
 0x2bb   : > { %574 = vpush %v442_v24 }
 0x2ec   : > { %s575_s11 = spop %574 }
 0x2ed   : > { %v445_v25 = vstv %s575_s11 }
 0x2ee   : > { %447 = vst.msk [vmem:[%s265_s10] sm:$0x1] %vm446_vm3, %v445_v25 }
 0x2ef PF: > { %p17_p9 = scmp.ge.s32.totalorder %s843_s25, 4   ;;  %s1005_s15 = smov %s757_s16 }
 0x2f0   : > { %s1006_s16 = smov %s761_s17  ;;  %s1007_s17 = smov %s872_s14 }
 0x2f1   : > { %s1008_s18 = smov %s843_s25  ;;  %19 = sbr.rel (!%p17_p9) target bundleno = 5 (0x5), region = 93 }
 0x2f8   :  { %465 = vsyncpa [#allocation3], 1 }
 0x2f9   :  { %467 = vsyncpa [#allocation3 + $0x1], 1 }
 0x2fa   :  { %468 = vsyncpa [#allocation5], 1 }
 0x2fb   :  { %470 = vsyncpa [#allocation5 + $0x1], 1 }

</bundles_post_ra>
